<compile_context>
chip_gen: v6e
topology: v6e:2x2x1
jax: 0.10.0
libtpu: 0.0.40
codegen_flags: <defaults>
</compile_context>

<pallas_src>
import jax
import jax.numpy as jnp
from jax.experimental import pallas as pl
from jax.experimental.pallas import tpu as pltpu


def _round_up(x, m):
    return ((x + m - 1) // m) * m


def _fused_kernel(x_ref, p_ref, wc_ref, bc_ref, wf_ref, bf_ref, o_ref):
    # x_ref : (kB, HW, Kp)    bf16  im2col patches for kB images (lane-dense K)
    # p_ref : (kB, kB*HW)     f32   block-diagonal pooling matrix, scaled by 1/(H*W)
    # wc_ref: (Kp, Fp)        bf16  conv weight, (tap, channel)-major rows
    # bc_ref: (1, Fp)         f32
    # wf_ref: (Fp, Sp)        bf16
    # bf_ref: (1, Sp)         f32
    # o_ref : (kB, Sp)        f32
    kB, HW, Kp = x_ref.shape

    x = x_ref[...].reshape(kB * HW, Kp)                               # bf16

    # base_net.forward_features: 3x3 same-padded conv as one K=9*C (->128) matmul.
    y = jnp.dot(x, wc_ref[...], preferred_element_type=jnp.float32)   # (kB*HW, Fp)
    y = jnp.maximum(y + bc_ref[...], 0.0)                             # bias + ReLU

    # Global average pool on the MXU (1/(H*W) folded into the pooling matrix).
    feat = jnp.dot(p_ref[...], y, preferred_element_type=jnp.float32)  # (kB, Fp)

    # Embedding head: Linear -> ReLU -> torch.renorm(p=2, dim=0, maxnorm=1).
    z = jnp.dot(feat.astype(jnp.bfloat16), wf_ref[...],
                preferred_element_type=jnp.float32) + bf_ref[...]     # (kB, Sp)
    z = jnp.maximum(z, 0.0)
    sumsq = jnp.sum(z * z, axis=1, keepdims=True)                     # (kB, 1)
    norm = jnp.sqrt(sumsq)
    # Exact reciprocal: matches torch's maxnorm / (norm + 1e-7) behavior.
    scale = jnp.where(norm > 1.0, pl.reciprocal(norm + 1e-7, approx=False), 1.0)
    o_ref[...] = (z * scale).astype(o_ref.dtype)


@jax.jit
def embedding_net_forward(x, params):
    """EmbeddingNet.forward for NCHW x (synthetic conv+ReLU+GAP base net)."""
    B, C, H, W = x.shape
    w_conv = params["w_conv"]            # (3, 3, C, F)
    b_conv = params["b_conv"]            # (F,)
    w_fc = params["w_fc"]                # (F, S)
    b_fc = params["b_fc"]                # (S,)
    F = w_conv.shape[-1]
    S = w_fc.shape[-1]
    HW = H * W
    K = 9 * C
    Kp = _round_up(K, 128)               # lane-dense contraction width
    Fp = _round_up(F, 128)               # lane-dense feature width
    Sp = _round_up(S, 128)               # lane-dense embedding width

    # Batch block: amortize per-step overhead, but keep >= 2 grid steps (v7x 2-TC).
    kB = min(8, max(1, B // 2))
    Bp = _round_up(B, kB)
    nblk = Bp // kB

    # im2col in the wrapper (tiny HBM blowup at these shapes: ~B*HW*Kp bf16 bytes).
    xp = jnp.pad(x, ((0, 0), (0, 0), (1, 1), (1, 1)))
    taps = [xp[:, :, di:di + H, dj:dj + W] for di in range(3) for dj in range(3)]
    patches = jnp.stack(taps, axis=1)                          # (B, 9, C, H, W)
    patches = jnp.transpose(patches, (0, 3, 4, 1, 2)).reshape(B, HW, K)
    patches = jnp.pad(patches, ((0, Bp - B), (0, 0), (0, Kp - K)))
    patches = patches.astype(jnp.bfloat16)                     # (Bp, HW, Kp)

    # Block-diagonal pooling matrix with 1/(H*W) folded in; kept f32 for the pool.
    pool = jnp.kron(jnp.eye(kB, dtype=jnp.float32),
                    jnp.full((1, HW), 1.0 / HW, jnp.float32))  # (kB, kB*HW)

    # Zero-pad params to 128-lane widths; matmul operands bf16, biases f32.
    wc = jnp.pad(w_conv.reshape(K, F),
                 ((0, Kp - K), (0, Fp - F))).astype(jnp.bfloat16)
    bc = jnp.pad(b_conv, (0, Fp - F)).reshape(1, Fp).astype(jnp.float32)
    wf = jnp.pad(w_fc, ((0, Fp - F), (0, Sp - S))).astype(jnp.bfloat16)
    bf = jnp.pad(b_fc, (0, Sp - S)).reshape(1, Sp).astype(jnp.float32)

    out = pl.pallas_call(
        _fused_kernel,
        out_shape=jax.ShapeDtypeStruct((nblk, kB, Sp), jnp.float32),
        grid=(nblk,),
        in_specs=[
            pl.BlockSpec((kB, HW, Kp), lambda b: (b, 0, 0)),   # per-step batch block
            pl.BlockSpec((kB, kB * HW), lambda b: (0, 0)),     # resident pool matrix
            pl.BlockSpec((Kp, Fp), lambda b: (0, 0)),          # resident conv weight
            pl.BlockSpec((1, Fp), lambda b: (0, 0)),           # resident conv bias
            pl.BlockSpec((Fp, Sp), lambda b: (0, 0)),          # resident fc weight
            pl.BlockSpec((1, Sp), lambda b: (0, 0)),           # resident fc bias
        ],
        out_specs=pl.BlockSpec((None, kB, Sp), lambda b: (b, 0, 0)),
        compiler_params=pltpu.CompilerParams(
            dimension_semantics=("parallel",),
            vmem_limit_bytes=32 * 1024 * 1024),
    )(patches, pool, wc, bc, wf, bf)
    # TODO(synk): for very large H*W, also tile the spatial axis with an
    # "arbitrary" reduction dimension; unnecessary at these sizes.
    return out.reshape(Bp, Sp)[:B, :S]


def init_params(key, in_ch, num_features, size):
    k1, k2, k3, k4 = jax.random.split(key, 4)
    w_conv = jax.random.normal(k1, (3, 3, in_ch, num_features), jnp.float32) * 0.1
    b_conv = jax.random.normal(k2, (num_features,), jnp.float32) * 0.01
    w_fc = jax.random.normal(k3, (num_features, size), jnp.float32) * 0.1
    b_fc = jax.random.normal(k4, (size,), jnp.float32) * 0.01
    return {"w_conv": w_conv, "b_conv": b_conv, "w_fc": w_fc, "b_fc": b_fc}


def _reference(x, params):
    """Pure-JAX f32 reference of the same synthetic base net + embedding head."""
    B, C, H, W = x.shape
    xp = jnp.pad(x, ((0, 0), (0, 0), (1, 1), (1, 1)))
    taps = [xp[:, :, di:di + H, dj:dj + W] for di in range(3) for dj in range(3)]
    patches = jnp.transpose(jnp.stack(taps, axis=1),
                            (0, 3, 4, 1, 2)).reshape(B, H * W, 9 * C)
    wc = params["w_conv"].reshape(9 * C, -1)
    y = jnp.maximum(jnp.einsum("bmk,kf->bmf", patches, wc) + params["b_conv"], 0.0)
    feat = jnp.mean(y, axis=1)
    z = jnp.maximum(feat @ params["w_fc"] + params["b_fc"], 0.0)
    norm = jnp.sqrt(jnp.sum(z * z, axis=1, keepdims=True))
    scale = jnp.where(norm > 1.0, 1.0 / (norm + 1e-7), 1.0)
    return z * scale


if __name__ == "__main__":
    B, C, H, W = 2, 4, 16, 16       # small NCHW input
    NUM_FEATURES = 32               # base_net.num_features
    SIZE = 64                       # EmbeddingNet size (small stand-in for 512)

    key = jax.random.PRNGKey(0)
    kx, kp = jax.random.split(key)
    x = jax.random.normal(kx, (B, C, H, W), jnp.float32)
    params = init_params(kp, C, NUM_FEATURES, SIZE)

    out = embedding_net_forward(x, params)
    out = jax.block_until_ready(out)

    # Sanity checks: shape, renorm constraint (row L2 norms <= 1), and f32 reference
    # match within bf16 tolerance.
    assert out.shape == (B, SIZE)
    row_norms = jnp.sqrt(jnp.sum(out * out, axis=1))
    assert bool(jnp.all(row_norms <= 1.0 + 1e-5))
    ref = _reference(x, params)
    assert bool(jnp.allclose(out, ref, atol=3e-2, rtol=3e-2))

    print("KERNEL_OK")
</pallas_src>

<mosaic_0001>
module attributes {stable_mosaic.version = 11 : i64} {
  func.func @_fused_kernel(%arg0: i32, %arg1: memref<1x256x128xbf16, #tpu.memory_space<vmem>>, %arg2: memref<1x256xf32, #tpu.memory_space<vmem>>, %arg3: memref<128x128xbf16, #tpu.memory_space<vmem>>, %arg4: memref<1x128xf32, #tpu.memory_space<vmem>>, %arg5: memref<128x128xbf16, #tpu.memory_space<vmem>>, %arg6: memref<1x128xf32, #tpu.memory_space<vmem>>, %arg7: memref<1x1x128xf32, #tpu.memory_space<vmem>>) attributes {dimension_semantics = [#tpu.dimension_semantics<parallel>], iteration_bounds = array<i64: 2>, scalar_prefetch = 0 : i64, scratch_operands = 0 : i64, tpu.core_type = #tpu.core_type<tc>, window_params = [{transform_indices = @transform_0, window_bounds = array<i64: 1, 256, 128>}, {pipeline_mode = #tpu.pipeline_mode<synchronous>, transform_indices = @transform_1, window_bounds = array<i64: 1, 256>}, {pipeline_mode = #tpu.pipeline_mode<synchronous>, transform_indices = @transform_2, window_bounds = array<i64: 128, 128>}, {pipeline_mode = #tpu.pipeline_mode<synchronous>, transform_indices = @transform_3, window_bounds = array<i64: 1, 128>}, {pipeline_mode = #tpu.pipeline_mode<synchronous>, transform_indices = @transform_4, window_bounds = array<i64: 128, 128>}, {pipeline_mode = #tpu.pipeline_mode<synchronous>, transform_indices = @transform_5, window_bounds = array<i64: 1, 128>}, {transform_indices = @transform_6, window_bounds = array<i64: 1, 1, 128>}]} {
    %c0 = arith.constant 0 : index
    %c0_0 = arith.constant 0 : index
    %c0_1 = arith.constant 0 : index
    %0 = vector.load %arg1[%c0, %c0_0, %c0_1] : memref<1x256x128xbf16, #tpu.memory_space<vmem>>, vector<1x256x128xbf16>
    %1 = vector.shape_cast %0 : vector<1x256x128xbf16> to vector<256x128xbf16>
    %c0_2 = arith.constant 0 : index
    %c0_3 = arith.constant 0 : index
    %2 = vector.load %arg3[%c0_2, %c0_3] : memref<128x128xbf16, #tpu.memory_space<vmem>>, vector<128x128xbf16>
    %cst = arith.constant dense<0.000000e+00> : vector<256x128xf32>
    %3 = tpu.matmul %1, %2, %cst {dimension_numbers = #tpu.dot_dimension_numbers<[1], [0], [0], [1], [0, 0, 1, 1], [], []>} : vector<256x128xbf16>, vector<128x128xbf16>, vector<256x128xf32> -> vector<256x128xf32>
    %c0_4 = arith.constant 0 : index
    %c0_5 = arith.constant 0 : index
    %4 = vector.load %arg4[%c0_4, %c0_5] : memref<1x128xf32, #tpu.memory_space<vmem>>, vector<1x128xf32>
    %5 = vector.broadcast %4 : vector<1x128xf32> to vector<256x128xf32>
    %6 = arith.addf %3, %5 : vector<256x128xf32>
    %cst_6 = arith.constant 0.000000e+00 : f32
    %7 = vector.broadcast %cst_6 : f32 to vector<256x128xf32>
    %8 = arith.maximumf %6, %7 : vector<256x128xf32>
    %c0_7 = arith.constant 0 : index
    %c0_8 = arith.constant 0 : index
    %9 = vector.load %arg2[%c0_7, %c0_8] : memref<1x256xf32, #tpu.memory_space<vmem>>, vector<1x256xf32>
    %cst_9 = arith.constant dense<0.000000e+00> : vector<1x128xf32>
    %10 = tpu.matmul %9, %8, %cst_9 {dimension_numbers = #tpu.dot_dimension_numbers<[1], [0], [0], [1], [0, 0, 1, 1], [], []>} : vector<1x256xf32>, vector<256x128xf32>, vector<1x128xf32> -> vector<1x128xf32>
    %11 = arith.truncf %10 : vector<1x128xf32> to vector<1x128xbf16>
    %c0_10 = arith.constant 0 : index
    %c0_11 = arith.constant 0 : index
    %12 = vector.load %arg5[%c0_10, %c0_11] : memref<128x128xbf16, #tpu.memory_space<vmem>>, vector<128x128xbf16>
    %cst_12 = arith.constant dense<0.000000e+00> : vector<1x128xf32>
    %13 = tpu.matmul %11, %12, %cst_12 {dimension_numbers = #tpu.dot_dimension_numbers<[1], [0], [0], [1], [0, 0, 1, 1], [], []>} : vector<1x128xbf16>, vector<128x128xbf16>, vector<1x128xf32> -> vector<1x128xf32>
    %c0_13 = arith.constant 0 : index
    %c0_14 = arith.constant 0 : index
    %14 = vector.load %arg6[%c0_13, %c0_14] : memref<1x128xf32, #tpu.memory_space<vmem>>, vector<1x128xf32>
    %15 = arith.addf %13, %14 : vector<1x128xf32>
    %cst_15 = arith.constant 0.000000e+00 : f32
    %16 = vector.broadcast %cst_15 : f32 to vector<1x128xf32>
    %17 = arith.maximumf %15, %16 : vector<1x128xf32>
    %18 = arith.mulf %17, %17 : vector<1x128xf32>
    %cst_16 = arith.constant dense<0.000000e+00> : vector<1xf32>
    %19 = vector.multi_reduction <add>, %18, %cst_16 [1] : vector<1x128xf32> to vector<1xf32>
    %20 = vector.shape_cast %19 : vector<1xf32> to vector<1x1xf32>
    %21 = math.sqrt %20 : vector<1x1xf32>
    %cst_17 = arith.constant 1.000000e+00 : f32
    %22 = vector.broadcast %cst_17 : f32 to vector<1x1xf32>
    %23 = arith.cmpf ogt, %21, %22 : vector<1x1xf32>
    %cst_18 = arith.constant 1.000000e-07 : f32
    %24 = vector.broadcast %cst_18 : f32 to vector<1x1xf32>
    %25 = arith.addf %21, %24 : vector<1x1xf32>
    %26 = tpu.reciprocal %25 : vector<1x1xf32> -> vector<1x1xf32>
    %cst_19 = arith.constant 1.000000e+00 : f32
    %27 = vector.broadcast %cst_19 : f32 to vector<1x1xf32>
    %28 = arith.select %23, %26, %27 : vector<1x1xi1>, vector<1x1xf32>
    %29 = vector.broadcast %28 : vector<1x1xf32> to vector<1x128xf32>
    %30 = arith.mulf %17, %29 : vector<1x128xf32>
    %c0_20 = arith.constant 0 : index
    %c0_21 = arith.constant 0 : index
    %c0_22 = arith.constant 0 : index
    %31 = vector.load %arg7[%c0_20, %c0_21, %c0_22] : memref<1x1x128xf32, #tpu.memory_space<vmem>>, vector<1x1x128xf32>
    %32 = vector.shape_cast %31 : vector<1x1x128xf32> to vector<1x128xf32>
    %33 = vector.shape_cast %30 : vector<1x128xf32> to vector<1x1x128xf32>
    tpu.vector_store %arg7[%c0_20, %c0_21, %c0_22], %33 {strides = array<i32>} : memref<1x1x128xf32, #tpu.memory_space<vmem>>, vector<1x1x128xf32>,
    return
  }
  func.func @transform_0(%arg0: i32) -> (i32, i32, i32) {
    %c0_i32 = arith.constant 0 : i32
    %c0_i32_0 = arith.constant 0 : i32
    %c0_i32_1 = arith.constant 0 : i32
    return %arg0, %c0_i32, %c0_i32_0 : i32, i32, i32
  }
  func.func @transform_1(%arg0: i32) -> (i32, i32) {
    %c0_i32 = arith.constant 0 : i32
    %c0_i32_0 = arith.constant 0 : i32
    %c0_i32_1 = arith.constant 0 : i32
    return %c0_i32, %c0_i32_0 : i32, i32
  }
  func.func @transform_2(%arg0: i32) -> (i32, i32) {
    %c0_i32 = arith.constant 0 : i32
    %c0_i32_0 = arith.constant 0 : i32
    %c0_i32_1 = arith.constant 0 : i32
    return %c0_i32, %c0_i32_0 : i32, i32
  }
  func.func @transform_3(%arg0: i32) -> (i32, i32) {
    %c0_i32 = arith.constant 0 : i32
    %c0_i32_0 = arith.constant 0 : i32
    %c0_i32_1 = arith.constant 0 : i32
    return %c0_i32, %c0_i32_0 : i32, i32
  }
  func.func @transform_4(%arg0: i32) -> (i32, i32) {
    %c0_i32 = arith.constant 0 : i32
    %c0_i32_0 = arith.constant 0 : i32
    %c0_i32_1 = arith.constant 0 : i32
    return %c0_i32, %c0_i32_0 : i32, i32
  }
  func.func @transform_5(%arg0: i32) -> (i32, i32) {
    %c0_i32 = arith.constant 0 : i32
    %c0_i32_0 = arith.constant 0 : i32
    %c0_i32_1 = arith.constant 0 : i32
    return %c0_i32, %c0_i32_0 : i32, i32
  }
  func.func @transform_6(%arg0: i32) -> (i32, i32, i32) {
    %c0_i32 = arith.constant 0 : i32
    %c0_i32_0 = arith.constant 0 : i32
    %c0_i32_1 = arith.constant 0 : i32
    return %arg0, %c0_i32, %c0_i32_0 : i32, i32, i32
  }
}

</mosaic_0001>

<bundles_post_ra>
// kernel: embedding_net_forward.1
= control target key start
LH: loop header
LB: loop body
LE: loop exit
PB: predicated region body
PF: predicated region fallthrough
CT: control target
= control target key end

     0   :  { %11 = vsyncpa [#allocation3], 0  ;;  %s1511_s0 = inlined_call_operand.vmem [shape: bf16[2,256,128], index: 0, kind: input, shape index: {}]   ;;  %s1512_s1 = inlined_call_operand.vmem [shape: f32[1,256], index: 1, kind: input, shape index: {}]   ;;  %s1513_s2 = inlined_call_operand.vmem [shape: bf16[128,128], index: 2, kind: input, shape index: {}]   ;;  %s1514_s3 = inlined_call_operand.vmem [shape: f32[1,128], index: 3, kind: input, shape index: {}]   ;;  %s1515_s4 = inlined_call_operand.vmem [shape: bf16[128,128], index: 4, kind: input, shape index: {}]   ;;  %s1516_s5 = inlined_call_operand.vmem [shape: f32[1,128], index: 5, kind: input, shape index: {}]   ;;  %s1517_s6 = inlined_call_operand.hbm [shape: f32[2,1,128], index: 6, kind: output, shape index: {}]  }
   0x1   :  { %13 = vsyncpa [#allocation3 + $0x1], 0  ;;  %s1273_s21 = smov 0   ;;  %s1275_s22 = smov 0  }
   0x2   :  { %s1277_s23 = smov 0   ;;  %s1279_s24 = smov 0  }
   0x3 LB: > { %s1294_s25 = sadd.s32 4294967295, %s1233_s24   ;;  %s917_s26 = sadd.s32 4294967294, %s1233_s24   ;;  %s1233_s24 = sphi %s1279_s24, %s1523_s24   ;;  %s1229_s23 = sphi %s1277_s23, %s1522_s23   ;;  %s1225_s22 = sphi %s1275_s22, %s1521_s22   ;;  %s1221_s21 = sphi %s1273_s21, %s1520_s21  }
   0x4   : > { %s1298_s27 = sadd.s32 1, %s1233_s24   ;;  %s157_s28 = sadd.s32 1, %s1229_s23 }
   0x5   : > { %s154_s29 = ssub.s32 %s1233_s24, %s1298_s27  ;;  %p167_p0 = scmp.ne.s32.totalorder %s1229_s23, %s1225_s22 }
   0x6   : > { %p155_p1 = scmp.eq.s32.totalorder %s154_s29, 0  ;;  %p168_p2 = scmp.eq.s32.totalorder %s1294_s25, 1 }
   0x7   : > { %p173_p3 = scmp.ne.s32.totalorder %s1225_s22, %s1221_s21  ;;  %p174_p4 = scmp.eq.s32.totalorder %s917_s26, 1 }
   0x8   : > { %s1309_s30 = scalar_select %p155_p1, %s1229_s23, %s157_s28  }
   0x9   : > { %p1311_p5 = por %p168_p2, %p167_p0  ;;  %p1315_p6 = por %p174_p4, %p173_p3 }
   0xa   : > { %p920_p7 = scmp.ge.s32.totalorder %s1233_s24, 1  ;;  %p215_p8 = scmp.lt.s32.totalorder %s1233_s24, 3 }
   0xc   : > { %p216_p9 = pnand %p920_p7, %p215_p8 }
   0xd   : > { %p244_p10 = scmp.lt.s32.totalorder (!%p216_p9), %s1294_s25, 1  ;;  %s242_s28 = sand.u32 (!%p216_p9), 1, %s1225_s22  }
   0xe   : > { %219 = sbr.rel (%p216_p9) target bundleno = 928 (0x3a0), region = 44  ;;  %s956_s29 = sshll.u32 (!%p216_p9), %s1294_s25, 4 }
   0xf   : > { %s243_s9 = scalar_lea.vmem (!%p216_p9), [#allocation2], %s242_s28  ;;  %s850_s14 = scalar_lea.sflag (!%p216_p9), [#allocation3], %s242_s28 }
  0x10   : > { %s862_s10 = sshll.u32 (!%p216_p9), %s243_s9, 4  ;;  %s863_s10 = int_to_ptr.vmem [resolvable:$true] %s862_s10 }
  0x11   : > { %s1173_s15 = scalar_lea.vmem (!%p216_p9), %s863_s10, 16 }
  0x12   : > { %p1174_p11 = scmp.ne.s32.totalorder (!%p216_p9), %s863_s10, %s1173_s15 }
  0x13   : > { %v1137_v0 = vld [vmem:[%s1513_s2 + $0x38] sm:$0xff]   ;;  %v1138_v1 = vld [vmem:[%s1513_s2 + $0x30] sm:$0xff]   ;;  %s245_s13 = scalar_select %p244_p10, %s1294_s25, 1  ;;  %v1139_v2 = vld [vmem:[%s1513_s2 + $0x28] sm:$0xff]   ;;  %v644_v24 = vlaneseq  ;;  %vm1236_vm0 = vmmov 0   ;;  %vm832_vm1 = vcmask 1040384  }
  0x14   : > { %1028 = vmatprep.subr.bf16.mxu0 %v1137_v0  ;;  %v1140_v3 = vld [vmem:[%s1513_s2 + $0x20] sm:$0xff]   ;;  %v1141_v5 = vld [vmem:[%s1513_s2 + $0x18] sm:$0xff]   ;;  %v1142_v6 = vld [vmem:[%s1513_s2 + $0x10] sm:$0xff]   ;;  %p1175_p12 = pnand %p1174_p11, %p1311_p5 }
  0x15   : > { %1029 = vmatpush3.bf16.msra.mxu0 %v1137_v0  ;;  %s959_s16 = sshll.u32 %s245_s13, 7  ;;  %v1143_v7 = vld [vmem:[%s1513_s2 + $0x8] sm:$0xff]   ;;  %v1144_v8 = vld [vmem:[%s1513_s2] sm:$0xff]   ;;  %v645_v25 = vshrl.u32 %v644_v24, 7  ;;  %s860_s13 = scalar_lea.hbm %s1517_s6, %s956_s29 }
  0x16   : > { %1030 = vmatprep.subr.bf16.mxu0 %v1138_v1  ;;  %s1335_s19 = scalar_lea.vmem %s1511_s0, %s959_s16  ;;  %v642_v27 = vld [vmem:[%s1512_s1] sm:$0x3]  ;;  %p1176_p13 = pneg %p1175_p12 }
  0x17   : > { %v1145_v4 = vld [vmem:[%s1335_s19] sm:$0xff]   ;;  %v1146_v9 = vld [vmem:[%s1335_s19 + $0x8] sm:$0xff]   ;;  %v1147_v10 = vld [vmem:[%s1335_s19 + $0x10] sm:$0xff]   ;;  %v650_v26 = vsub.s32 1, %v645_v25  ;;  %v646_v28 = vsub.s32 0, %v645_v25  ;;  %s1237_s16 = smov [#allocation2]  }
  0x18   : > { %1044 = vmatprep.mubr.bf16.mxu0 %v1145_v4  ;;  %v1148_v11 = vld [vmem:[%s1335_s19 + $0x18] sm:$0xff]   ;;  %v1149_v12 = vld [vmem:[%s1335_s19 + $0x20] sm:$0xff]   ;;  %v1150_v13 = vld [vmem:[%s1335_s19 + $0x28] sm:$0xff]   ;;  %s1177_s25 = sshll.u32 %s1237_s16, 4  ;;  %s1178_s25 = int_to_ptr.vmem [resolvable:$false] %s1177_s25 }
  0x19   : > { %1031 = vmatpush3.bf16.msra.mxu0 %v1138_v1  ;;  %v1151_v14 = vld [vmem:[%s1335_s19 + $0x30] sm:$0xff]   ;;  %v1152_v15 = vld [vmem:[%s1335_s19 + $0x38] sm:$0xff]   ;;  %v1153_v16 = vld [vmem:[%s1335_s19 + $0x40] sm:$0xff]   ;;  %v651_v29 = vrot.slane %v642_v27, %v650_v26  ;;  %v1371_v30 = vrot.slane %v642_v27, %v646_v28  ;;  %s1179_s17 = scalar_lea.vmem %s1178_s25, 32  ;;  %p1180_p0 = scmp.lt.s32.totalorder %s863_s10, %s1178_s25 }
  0x1a   : > { %1032 = vmatprep.subr.bf16.mxu0 %v1139_v2  ;;  %v1154_v17 = vld [vmem:[%s1335_s19 + $0x48] sm:$0xff]   ;;  %v1155_v18 = vld [vmem:[%s1335_s19 + $0x50] sm:$0xff]   ;;  %v1156_v19 = vld [vmem:[%s1335_s19 + $0x58] sm:$0xff]   ;;  %p1181_p1 = scmp.lt.s32.totalorder %s1179_s17, %s1173_s15 }
  0x1b   : > { %v1157_v20 = vld [vmem:[%s1335_s19 + $0x60] sm:$0xff]   ;;  %v1158_v21 = vld [vmem:[%s1335_s19 + $0x68] sm:$0xff]   ;;  %v1159_v22 = vld [vmem:[%s1335_s19 + $0x70] sm:$0xff]   ;;  %718 = vmatprep.mubr.f32.mxu1 %v651_v29 }
  0x1c   : > { %v1160_v23 = vld [vmem:[%s1335_s19 + $0x78] sm:$0xff]   ;;  %v1402_v61 = vld [vmem:[%s1514_s3] ss:$0 sm:$0xff]  ;;  %p1182_p2 = por %p1181_p1, %p1180_p0 }
  0x1d   : > { %1033 = vmatpush3.bf16.msra.mxu0 %v1139_v2 }
  0x1e   : > { %1034 = vmatprep.subr.bf16.mxu0 %v1140_v3  ;;  %p1183_p3 = pnand %p1182_p2, %p1176_p13 }
  0x21   : > { %1035 = vmatpush3.bf16.msra.mxu0 %v1140_v3 }
  0x22   : > { %1036 = vmatprep.subr.bf16.mxu0 %v1141_v5 }
  0x25   : > { %1037 = vmatpush3.bf16.msra.mxu0 %v1141_v5 }
  0x26   : > { %1038 = vmatprep.subr.bf16.mxu0 %v1142_v6 }
  0x29   : > { %1039 = vmatpush3.bf16.msra.mxu0 %v1142_v6 }
  0x2a   : > { %1040 = vmatprep.subr.bf16.mxu0 %v1143_v7 }
  0x2d   : > { %1041 = vmatpush3.bf16.msra.mxu0 %v1143_v7 }
  0x2e   : > { %1042 = vmatprep.subr.bf16.mxu0 %v1144_v8 }
  0x31   : > { %1043 = vmatpush3.bf16.msra.mxu0 %v1144_v8 }
  0x34   : > { %1045 = vmatmul.mubr.bf16.vlgmr.msra.gmra.mxu0 %v1146_v9 }
  0x35   : > { %1048 = vmatprep.mubr.bf16.mxu0 %v1147_v10 }
  0x3c   : > { %1049 = vmatmul.mubr.bf16.gmra.mxu0 %v1148_v11 }
  0x3d   : > { %1052 = vmatprep.mubr.bf16.mxu0 %v1149_v12 }
  0x44   : > { %1053 = vmatmul.mubr.bf16.gmra.mxu0 %v1150_v13 }
  0x45   : > { %1056 = vmatprep.mubr.bf16.mxu0 %v1151_v14 }
  0x4c   : > { %1057 = vmatmul.mubr.bf16.gmra.mxu0 %v1152_v15 }
  0x4d   : > { %1060 = vmatprep.mubr.bf16.mxu0 %v1153_v16 }
  0x54   : > { %1061 = vmatmul.mubr.bf16.gmra.mxu0 %v1154_v17 }
  0x55   : > { %1064 = vmatprep.mubr.bf16.mxu0 %v1155_v18 }
  0x5c   : > { %1065 = vmatmul.mubr.bf16.gmra.mxu0 %v1156_v19 }
  0x5d   : > { %1068 = vmatprep.mubr.bf16.mxu0 %v1157_v20 }
  0x64   : > { %1069 = vmatmul.mubr.bf16.gmra.mxu0 %v1158_v21 }
  0x65   : > { %1072 = vmatprep.mubr.bf16.mxu0 %v1159_v22 }
  0x6c   : > { %1073 = vmatmul.mubr.bf16.gmra.mxu0 %v1160_v23 }
  0xf4   : > { %v1373_v31 = vpop.f32.mrf.mxu0 }
  0xf6   : > { %v1375_v32 = vpop.f32.mrf.mxu0 }
  0xf8   : > { %v1377_v33 = vpop.f32.mrf.mxu0 }
  0xfa   : > { %v1379_v34 = vpop.f32.mrf.mxu0 }
  0xfc   : > { %v1381_v35 = vpop.f32.mrf.mxu0 }
  0xfe   : > { %v1383_v36 = vpop.f32.mrf.mxu0 }
 0x100   : > { %v1385_v37 = vpop.f32.mrf.mxu0 }
 0x102   : > { %v1387_v38 = vpop.f32.mrf.mxu0 }
 0x104   : > { %v1054_v39 = vpop.f32.mrf.mxu0 }
 0x105   : > { %v524_v18 = vadd.f32 %v1054_v39, %v1402_v61  ;;  %v511_v39 = vadd.f32 %v1385_v37, %v1402_v61 }
 0x106   : > { %v515_v40 = vpop.f32.mrf.mxu0 }
 0x107   : > { %v620_v26 = vmax.f32 %v524_v18, 0.0  ;;  %v516_v27 = vadd.f32 %v1402_v61, %v515_v40 }
 0x108   : > { %v1055_v41 = vpop.f32.mrf.mxu0 }
 0x109   : > { %v527_v14 = vadd.f32 %v1055_v41, %v1402_v61 }
 0x10a   : > { %v518_v42 = vpop.f32.mrf.mxu0 }
 0x10b   : > { %v621_v22 = vmax.f32 %v527_v14, 0.0  ;;  %v519_v23 = vadd.f32 %v1402_v61, %v518_v42 }
 0x10c   : > { %v1058_v43 = vpop.f32.mrf.mxu0 }
 0x10d   : > { %v540_v2 = vadd.f32 %v1058_v43, %v1402_v61  ;;  %v619_v41 = vmax.f32 %v519_v23, 0.0 }
 0x10e   : > { %v531_v44 = vpop.f32.mrf.mxu0 }
 0x10f   : > { %v624_v10 = vmax.f32 %v540_v2, 0.0  ;;  %v532_v11 = vadd.f32 %v1402_v61, %v531_v44  ;;  %v508_v44 = vadd.f32 %v1381_v35, %v1402_v61  ;;  %v500_v35 = vadd.f32 %v1402_v61, %v1383_v36 }
 0x110   : > { %v1059_v45 = vpop.f32.mrf.mxu0 }
 0x111   : > { %v543_v62 = vadd.f32 %v1059_v45, %v1402_v61  ;;  %v622_v19 = vmax.f32 %v532_v11, 0.0  ;;  %v618_v45 = vmax.f32 %v516_v27, 0.0  ;;  %v614_v36 = vmax.f32 %v500_v35, 0.0 }
 0x112   : > { %v534_v46 = vpop.f32.mrf.mxu0 }
 0x113   : > { %v625_v6 = vmax.f32 %v543_v62, 0.0  ;;  %v535_v7 = vadd.f32 %v1402_v61, %v534_v46 }
 0x114   : > { %v1389_v47 = vpop.f32.mrf.mxu0 }
 0x115   : > { %v623_v15 = vmax.f32 %v535_v7, 0.0  ;;  %v1167_v7 = vld [vmem:[%s1515_s4 + $0x8] sm:$0xff]  }
 0x116   : > { %v1391_v48 = vpop.f32.mrf.mxu0 }
 0x118   : > { %v1393_v49 = vpop.f32.mrf.mxu0 }
 0x11a   : > { %v1395_v50 = vpop.f32.mrf.mxu0 }
 0x11c   : > { %v1066_v51 = vpop.f32.mrf.mxu0 }
 0x11d   : > { %v572_v42 = vadd.f32 %v1066_v51, %v1402_v61 }
 0x11e   : > { %v1397_v52 = vpop.f32.mrf.mxu0 }
 0x11f   : > { %v632_v37 = vmax.f32 %v572_v42, 0.0  ;;  %v564_v51 = vadd.f32 %v1402_v61, %v1397_v52 }
 0x120   : > { %v1067_v53 = vpop.f32.mrf.mxu0 }
 0x121   : > { %v575_v28 = vadd.f32 %v1067_v53, %v1402_v61  ;;  %v617_v53 = vmax.f32 %v511_v39, 0.0  ;;  %v630_v52 = vmax.f32 %v564_v51, 0.0 }
 0x122   : > { %v566_v54 = vpop.f32.mrf.mxu0 }
 0x123   : > { %v633_v40 = vmax.f32 %v575_v28, 0.0  ;;  %v567_v46 = vadd.f32 %v1402_v61, %v566_v54 }
 0x124   : > { %v1070_v55 = vpop.f32.mrf.mxu0 }
 0x125   : > { %v588_v16 = vadd.f32 %v1070_v55, %v1402_v61  ;;  %v503_v55 = vadd.f32 %v1402_v61, %v1387_v38  ;;  %v631_v54 = vmax.f32 %v567_v46, 0.0 }
 0x126   : > { %v579_v56 = vpop.f32.mrf.mxu0 }
 0x127   : > { %v636_v24 = vmax.f32 %v588_v16, 0.0  ;;  %v580_v25 = vadd.f32 %v1402_v61, %v579_v56  ;;  %v616_v56 = vmax.f32 %v508_v44, 0.0  ;;  %v615_v38 = vmax.f32 %v503_v55, 0.0 }
 0x128   : > { %v1071_v57 = vpop.f32.mrf.mxu0 }
 0x129   : > { %v591_v12 = vadd.f32 %v1071_v57, %v1402_v61  ;;  %v634_v43 = vmax.f32 %v580_v25, 0.0  ;;  %v559_v57 = vadd.f32 %v1393_v49, %v1402_v61  ;;  %v551_v49 = vadd.f32 %v1402_v61, %v1395_v50 }
 0x12a   : > { %v582_v58 = vpop.f32.mrf.mxu0 }
 0x12b   : > { %v637_v20 = vmax.f32 %v591_v12, 0.0  ;;  %v583_v21 = vadd.f32 %v1402_v61, %v582_v58  ;;  %v495_v58 = vadd.f32 %v1377_v33, %v1402_v61  ;;  %v629_v62 = vmax.f32 %v559_v57, 0.0 }
 0x12c   : > { %v1074_v59 = vpop.f32.mrf.mxu0  ;;  %v487_v33 = vadd.f32 %v1402_v61, %v1379_v34  ;;  %v627_v2 = vmax.f32 %v551_v49, 0.0  ;;  %v1161_v34 = vld [vmem:[%s1515_s4 + $0x38] sm:$0xff]  }
 0x12d   : > { %v604_v0 = vadd.f32 %v1074_v59, %v1402_v61  ;;  %v635_v29 = vmax.f32 %v583_v21, 0.0  ;;  %v556_v59 = vadd.f32 %v1389_v47, %v1402_v61  ;;  %v548_v47 = vadd.f32 %v1402_v61, %v1391_v48 }
 0x12e   : > { %v595_v60 = vpop.f32.mrf.mxu0  ;;  %v1235_v48 = vmov 0.0  }
 0x12f   : > { %v640_v8 = vmax.f32 %v604_v0, 0.0  ;;  %v596_v9 = vadd.f32 %v1402_v61, %v595_v60  ;;  %v492_v60 = vadd.f32 %v1373_v31, %v1402_v61  ;;  %v628_v0 = vmax.f32 %v556_v59, 0.0 }
 0x130   : > { %v1075_v63 = vpop.f32.mrf.mxu0  ;;  %v484_v31 = vadd.f32 %v1402_v61, %v1375_v32  ;;  %v626_v50 = vmax.f32 %v548_v47, 0.0  ;;  %v1162_v32 = vld [vmem:[%s1515_s4 + $0x30] sm:$0xff]  }
 0x131   : > { %v607_v1 = vadd.f32 %v1075_v63, %v1402_v61  ;;  %v638_v17 = vmax.f32 %v596_v9, 0.0  ;;  %v613_v63 = vmax.f32 %v495_v58, 0.0 }
 0x132   : > { %v598_v3 = vpop.f32.mrf.mxu0 }
 0x133   : > { %v599_v4 = vadd.f32 %v1402_v61, %v598_v3  ;;  %v641_v5 = vmax.f32 %v607_v1, 0.0  ;;  %v612_v1 = vmax.f32 %v492_v60, 0.0  ;;  %v611_v3 = vmax.f32 %v487_v33, 0.0  ;;  %v1163_v61 = vld [vmem:[%s1515_s4 + $0x28] sm:$0xff]  }
 0x135   : > { %984 = vmatprep.subr.mxu1 %v641_v5  ;;  %v639_v13 = vmax.f32 %v599_v4, 0.0  ;;  %v610_v4 = vmax.f32 %v484_v31, 0.0  ;;  %v1164_v5 = vld [vmem:[%s1515_s4 + $0x20] sm:$0xff]  }
 0x136   : > { %985 = vmatpush3.msra.mxu1 %v625_v6  ;;  %v1166_v6 = vld [vmem:[%s1515_s4 + $0x10] sm:$0xff]  }
 0x137   : > { %986 = vmatprep.subr.mxu1 %v640_v8  ;;  %v1168_v8 = vld [vmem:[%s1515_s4] sm:$0xff]  }
 0x138   : > { %987 = vmatpush3.msra.mxu1 %v624_v10 }
 0x139   : > { %988 = vmatprep.subr.mxu1 %v639_v13  ;;  %v741_v13 = vld [vmem:[%s1516_s5] sm:$0x1] }
 0x13a   : > { %989 = vmatpush3.msra.mxu1 %v623_v15 }
 0x13b   : > { %990 = vmatprep.subr.mxu1 %v638_v17 }
 0x13c   : > { %991 = vmatpush3.msra.mxu1 %v622_v19 }
 0x13d   : > { %992 = vmatprep.subr.mxu1 %v637_v20 }
 0x13e   : > { %993 = vmatpush3.msra.mxu1 %v621_v22 }
 0x13f   : > { %994 = vmatprep.subr.mxu1 %v636_v24 }
 0x140   : > { %995 = vmatpush3.msra.mxu1 %v620_v26 }
 0x141   : > { %996 = vmatprep.subr.mxu1 %v635_v29 }
 0x142   : > { %997 = vmatpush3.msra.mxu1 %v619_v41 }
 0x143   : > { %998 = vmatprep.subr.mxu1 %v634_v43 }
 0x144   : > { %999 = vmatpush3.msra.mxu1 %v618_v45 }
 0x145   : > { %1000 = vmatprep.subr.mxu1 %v633_v40 }
 0x146   : > { %1001 = vmatpush3.msra.mxu1 %v617_v53 }
 0x147   : > { %1002 = vmatprep.subr.mxu1 %v632_v37 }
 0x148   : > { %1003 = vmatpush3.msra.mxu1 %v616_v56 }
 0x149   : > { %1004 = vmatprep.subr.mxu1 %v631_v54 }
 0x14a   : > { %1005 = vmatpush3.msra.mxu1 %v615_v38 }
 0x14b   : > { %1006 = vmatprep.subr.mxu1 %v630_v52 }
 0x14c   : > { %1007 = vmatpush3.msra.mxu1 %v614_v36 }
 0x14d   : > { %1008 = vmatprep.subr.mxu1 %v629_v62 }
 0x14e   : > { %1009 = vmatpush3.msra.mxu1 %v613_v63 }
 0x14f   : > { %1010 = vmatprep.subr.mxu1 %v628_v0 }
 0x150   : > { %1011 = vmatpush3.msra.mxu1 %v612_v1 }
 0x151   : > { %1012 = vmatprep.subr.mxu1 %v627_v2 }
 0x152   : > { %1013 = vmatpush3.msra.mxu1 %v611_v3 }
 0x153   : > { %1014 = vmatprep.subr.mxu1 %v626_v50 }
 0x154   : > { %1015 = vmatpush3.msra.mxu1 %v610_v4 }
 0x155   : > { %719 = vmatmul.mubr.f32.vlgmr.msra.gmra.mxu1 %v1371_v30  ;;  %1076 = vmatprep.subr.bf16.mxu1 %v1235_v48  ;;  %v1165_v30 = vld [vmem:[%s1515_s4 + $0x18] sm:$0xff]  }
 0x156   : > { %1077 = vmatpush3.bf16.msra.mxu1 %v1161_v34  ;;  %1092 = vmatprep.mubr.msk.bf16.mxu1 %vm1236_vm0, %v1235_v48 }
 0x157   : > { %1078 = vmatprep.subr.bf16.mxu1 %v1235_v48 }
 0x15a   : > { %1079 = vmatpush3.bf16.msra.mxu1 %v1162_v32 }
 0x15b   : > { %1080 = vmatprep.subr.bf16.mxu1 %v1235_v48 }
 0x15e   : > { %1081 = vmatpush3.bf16.msra.mxu1 %v1163_v61 }
 0x15f   : > { %1082 = vmatprep.subr.bf16.mxu1 %v1235_v48 }
 0x162   : > { %1083 = vmatpush3.bf16.msra.mxu1 %v1164_v5 }
 0x163   : > { %1084 = vmatprep.subr.bf16.mxu1 %v1235_v48 }
 0x166   : > { %1085 = vmatpush3.bf16.msra.mxu1 %v1165_v30 }
 0x167   : > { %1086 = vmatprep.subr.bf16.mxu1 %v1235_v48 }
 0x16a   : > { %1087 = vmatpush3.bf16.msra.mxu1 %v1166_v6 }
 0x16b   : > { %1088 = vmatprep.subr.bf16.mxu1 %v1235_v48 }
 0x16e   : > { %1089 = vmatpush3.bf16.msra.mxu1 %v1167_v7 }
 0x16f   : > { %1090 = vmatprep.subr.bf16.mxu1 %v1235_v48 }
 0x172   : > { %1091 = vmatpush3.bf16.msra.mxu1 %v1168_v8 }
 0x215   : > { %v1016_v9 = vpop.f32.mrf.mxu1 }
 0x217   : > { %v1017_v10 = vpop.f32.mrf.mxu1 }
 0x218   : > { %v1018_v11 = vadd.f32 %v1017_v10, %v1016_v9 }
 0x21a   : > { %v724_v12 = vpack.c.bf16 %v1018_v11, %v1018_v11 }
 0x21c   : > { %1093 = vmatmul.mubr.bf16.vlgmr.msra.gmra.mxu1 %v724_v12 }
 0x2dc   : > { %v824_v14 = vpop.f32.mrf.mxu1 }
 0x2dd   : > { %v825_v15 = vadd.f32 %v824_v14, %v741_v13 }
 0x2de   : > { %v1094_v16 = vpop.f32.mrf.mxu1 }
 0x2df   : > { %v830_v17 = vmax.f32 %v825_v15, 0.0 }
 0x2e0   : > { %v827_v18 = vpop.f32.mrf.mxu1 }
 0x2e1   : > { %v831_v19 = vmul.f32 %v830_v17, %v830_v17 }
 0x2e2   : > { %v1095_v20 = vpop.f32.mrf.mxu1 }
 0x2e3   : > { %v833_v21 = vsel %vm832_vm1, %v831_v19, 0.0 }
 0x2e4   : > { %834 = vadd.xlane.f32.xlu0 %v833_v21 }
 0x36d   : > { %v835_v22 = vpop.xlane.xlu0 %834 }
 0x36e   : > { %1169 = vrsqrt.f32 %v835_v22  ;;  %vm838_vm2 = vcmp.eq.f32.partialorder %v835_v22, inf  ;;  %v841_v25 = vand.u32 2147483648, %v835_v22  ;;  %vm840_vm3 = vcmp.eq.f32.partialorder %v835_v22, 0.0 }
 0x37b   : > { %v1170_v23 = vpop.eup %1169 }
 0x37c   : > { %v837_v24 = vmul.f32 %v1170_v23, %v835_v22 }
 0x37e   : > { %v839_v26 = vsel %vm838_vm2, %v835_v22, %v837_v24 }
 0x37f   : > { %v842_v27 = vsel %vm840_vm3, %v841_v25, %v839_v26 }
 0x380   : > { %v844_v28 = vadd.f32 1e-07, %v842_v27  ;;  %vm843_vm4 = vcmp.gt.f32.partialorder %v842_v27, 1.0 }
 0x382   : > { %1171 = vrcp.f32 %v844_v28 }
 0x38f   : > { %v1172_v29 = vpop.eup %1171 }
 0x390   : > { %v846_v39 = vsel %vm843_vm4, %v1172_v29, 1.0 }
 0x391   : > { %v847_v41 = vmul.f32 %v846_v39, %v830_v17 }
 0x393   : > { %848 = vst [vmem:[%s243_s9] sm:$0x1] %v847_v41 }
 0x394   : > { %1186 = shalt.err (!%p1183_p3)
}
 0x395   : > { %s1187_s18 = scalar_lea.hbm %s860_s13, 16  ;;  %s1191_s26 = scalar_lea.hbm %s1517_s6, 32 }
 0x396   : > { %p1188_p4 = scmp.ne.s32.totalorder %s860_s13, %s1187_s18  ;;  %p1192_p9 = scmp.lt.s32.totalorder %s860_s13, %s1517_s6 }
 0x397   : > { %p1193_p10 = scmp.lt.s32.totalorder %s1191_s26, %s1187_s18 }
 0x398   : > { %p1189_p7 = pnand %p1188_p4, %p1311_p5 }
 0x399   : > { %p1194_p11 = por %p1193_p10, %p1192_p9 }
 0x39a   : > { %p1190_p8 = pneg %p1189_p7 }
 0x39c   : > { %p1195_p12 = pnand %p1194_p11, %p1190_p8 }
 0x39e   : > { %1198 = shalt.err (!%p1195_p12)
}
 0x39f   : > { %1096 = dma.vmem_to_hbm [thread:$0]  (%p1311_p5), %s863_s10, 16, %s860_s13, %s850_s14  }
 0x3a0 PF: > { %p1102_p13 = scmp.ge.s32.totalorder %s1233_s24, 2  ;;  %s874_s9 = sand.u32 1, %s1221_s21  }
 0x3a1   : > { %s875_s11 = scalar_lea.sflag [#allocation3], %s874_s9 }
 0x3a2   : > { %p1099_p0 = pnand %p1102_p13, %p1315_p6 }
 0x3a4   : > { %p1100_p1 = pneg %p1099_p0 }
 0x3a6   : > { %1216 = dma.done.wait (%p1100_p1), %s875_s11, 16  }
 0x3a7   : > { %1218 = vsyncadd (%p1100_p1), %s875_s11, 4294967280  ;;  %p16_p2 = scmp.ge.s32.totalorder %s1298_s27, 4   ;;  %s1520_s21 = smov %s1225_s22 }
 0x3a8   : > { %s1521_s22 = smov %s1229_s23  ;;  %s1522_s23 = smov %s1309_s30 }
 0x3a9   : > { %s1523_s24 = smov %s1298_s27  ;;  %18 = sbr.rel (!%p16_p2) target bundleno = 3 (0x3), region = 79 }
 0x3ae   :  { %879 = vsyncpa [#allocation3], 1 }
 0x3af   :  { %881 = vsyncpa [#allocation3 + $0x1], 1 }

</bundles_post_ra>
